<compile_context>
chip_gen: v5e
topology: v5e:2x2
jax: 0.10.0
libtpu: 0.0.40
codegen_flags: <defaults>
</compile_context>

<pallas_src>
import collections
import functools
import math

import jax
import jax.numpy as jnp
from jax import lax
from jax.experimental import pallas as pl
from jax.experimental.pallas import tpu as pltpu


# ----------------------------------------------------------------------------
# Per-generation tuning knobs
# ----------------------------------------------------------------------------
_Cfg = collections.namedtuple(
    "_Cfg",
    ["lin_tm", "lin_tn", "lin_tk", "mxu_align", "attn_tq", "attn_tkv", "vmem_limit_bytes"],
)


def _tpu_generation():
    try:
        kind = jax.devices()[0].device_kind.lower()
    except Exception:
        return 0
    for g in (7, 6, 5):
        if f"v{g}" in kind:
            return g
    return 0


@functools.lru_cache(maxsize=None)
def _config():
    gen = _tpu_generation()
    if gen >= 7:
        # v7x: 64 MiB VMEM/TC -> smaller tiles, modest scoped limit; 256x256 MXU alignment.
        return _Cfg(256, 512, 512, 256, 256, 256, 40 * 1024 * 1024)
    if gen == 6:
        # v6e: 128 MiB VMEM, 256x256 MXU -> bigger, 256-aligned tiles.
        return _Cfg(512, 1024, 512, 256, 256, 512, 80 * 1024 * 1024)
    if gen == 5:
        # v5e: 128 MiB VMEM, 128x128 MXU -> bigger tiles, 128 alignment is enough.
        return _Cfg(512, 1024, 512, 128, 256, 512, 80 * 1024 * 1024)
    # Unknown chip: conservative tiles, default scoped VMEM limit.
    return _Cfg(256, 512, 512, 128, 128, 256, None)


def _pick_tile(dim, target, align, prefer_align=None):
    """Largest multiple of `align` (preferring `prefer_align`) <= target dividing dim, else full dim."""
    if dim <= target:
        return dim
    aligns = []
    if prefer_align is not None and prefer_align > align:
        aligns.append(prefer_align)
    aligns.append(align)
    for a in aligns:
        t = (target // a) * a
        while t >= a:
            if dim % t == 0:
                return t
            t -= a
    return dim


# ----------------------------------------------------------------------------
# Tiled matmul + bias kernel (Conv1D:  y = x @ W + b)
# ----------------------------------------------------------------------------
def _linear_kernel(x_ref, w_ref, b_ref, o_ref, acc_ref):
    k = pl.program_id(2)

    @pl.when(k == 0)
    def _():
        acc_ref[...] = jnp.zeros_like(acc_ref)

    # Native-dtype operands straight into the MXU; accumulation only in f32.
    acc_ref[...] += jnp.dot(x_ref[...], w_ref[...], preferred_element_type=jnp.float32)

    @pl.when(k == pl.num_programs(2) - 1)
    def _():
        o_ref[...] = (acc_ref[...] + b_ref[...].astype(jnp.float32)).astype(o_ref.dtype)


def linear(x, w, b):
    """x: (M, K), w: (K, N), b: (N,) -> (M, N) via Pallas tiled matmul."""
    M, K = x.shape
    K2, N = w.shape
    assert K == K2
    cfg = _config()
    tm = _pick_tile(M, cfg.lin_tm, 8)
    tn = _pick_tile(N, cfg.lin_tn, 128, prefer_align=cfg.mxu_align)
    tk = _pick_tile(K, cfg.lin_tk, 128, prefer_align=cfg.mxu_align)
    grid = (M // tm, N // tn, K // tk)
    b2 = b.reshape(1, N)

    return pl.pallas_call(
        _linear_kernel,
        out_shape=jax.ShapeDtypeStruct((M, N), x.dtype),
        grid_spec=pltpu.PrefetchScalarGridSpec(
            num_scalar_prefetch=0,
            grid=grid,
            in_specs=[
                pl.BlockSpec((tm, tk), lambda i, j, k: (i, k)),
                pl.BlockSpec((tk, tn), lambda i, j, k: (k, j)),
                pl.BlockSpec((1, tn), lambda i, j, k: (0, j)),
            ],
            out_specs=pl.BlockSpec((tm, tn), lambda i, j, k: (i, j)),
            scratch_shapes=[pltpu.VMEM((tm, tn), jnp.float32)],
        ),
        compiler_params=pltpu.CompilerParams(
            dimension_semantics=("parallel", "parallel", "arbitrary"),
            vmem_limit_bytes=cfg.vmem_limit_bytes,
        ),
    )(x, w, b2)


# ----------------------------------------------------------------------------
# Flash (online-softmax) causal attention, heads fused via lane slices.
# Grid: (B, q-tiles [parallel], kv-tiles [arbitrary]).
# ----------------------------------------------------------------------------
def _flash_attn_kernel(q_ref, k_ref, v_ref, o_ref, m_ref, l_ref, acc_ref,
                       *, n_head, head_dim, scale, tq, tkv):
    qi = pl.program_id(1)
    ki = pl.program_id(2)
    H, D = n_head, head_dim

    @pl.when(ki == 0)
    def _init():
        m_ref[...] = jnp.full_like(m_ref, -jnp.inf)
        l_ref[...] = jnp.zeros_like(l_ref)
        acc_ref[...] = jnp.zeros_like(acc_ref)

    q_start = qi * tq
    kv_start = ki * tkv

    # Skip KV tiles entirely above the causal diagonal (~halves MXU work).
    @pl.when(kv_start <= q_start + (tq - 1))
    def _compute():
        qb = q_ref[0]            # (tq, nx)   all heads, lane-dense
        kb = k_ref[0]            # (tkv, nx)
        vb = v_ref[0]            # (tkv, nx)
        if scale:
            qb = qb * (1.0 / math.sqrt(D))   # scale q (S*D muls), not scores (S*S)

        # Causal mask built once per grid step, outside the head loop.
        row = q_start + lax.broadcasted_iota(jnp.int32, (tq, tkv), 0)
        col = kv_start + lax.broadcasted_iota(jnp.int32, (tq, tkv), 1)
        causal = col <= row

        for h in range(H):
            sl = slice(h * D, (h + 1) * D)
            # q_h @ k_h^T : native-dtype operands into the MXU, f32 accumulation.
            s = lax.dot_general(
                qb[:, sl], kb[:, sl],
                (((1,), (1,)), ((), ())),
                preferred_element_type=jnp.float32,
            )
            # torch: w = w * b - 10000 * (1 - b)  ->  masked entries are exactly -10000.
            s = jnp.where(causal, s, -10000.0)

            m_prev = m_ref[h]                                     # (tq, 1)
            m_new = jnp.maximum(m_prev, jnp.max(s, axis=-1, keepdims=True))
            alpha = jnp.exp(m_prev - m_new)
            p = jnp.exp(s - m_new)
            l_ref[h] = alpha * l_ref[h] + jnp.sum(p, axis=-1, keepdims=True)
            acc_ref[:, sl] = alpha * acc_ref[:, sl] + jnp.dot(
                p.astype(vb.dtype), vb[:, sl], preferred_element_type=jnp.float32)
            m_ref[h] = m_new

    @pl.when(ki == pl.num_programs(2) - 1)
    def _finalize():
        for h in range(H):
            sl = slice(h * D, (h + 1) * D)
            acc_ref[:, sl] = acc_ref[:, sl] * pl.reciprocal(l_ref[h], approx=True)
        # Lane-dense (tq, nx) store: heads already merged in the accumulator layout.
        o_ref[0] = acc_ref[...].astype(o_ref.dtype)


def causal_flash_attention(qkv, *, nx, n_head, scale):
    """qkv: (B, S, 3*nx) from c_attn -> attention output (B, S, nx), heads merged."""
    B, S, three_nx = qkv.shape
    assert three_nx == 3 * nx and nx % n_head == 0
    D = nx // n_head
    cfg = _config()
    tq = _pick_tile(S, cfg.attn_tq, 8)
    tkv = _pick_tile(S, cfg.attn_tkv, 8)
    grid = (B, S // tq, S // tkv)

    kern = functools.partial(
        _flash_attn_kernel, n_head=n_head, head_dim=D, scale=scale, tq=tq, tkv=tkv)

    if nx % 128 == 0:
        # Fused head-split: read q/k/v chunks straight out of the qkv slab
        # (block index 0/1/2 along the last axis, block width nx).
        operands = (qkv, qkv, qkv)
        q_spec = pl.BlockSpec((1, tq, nx), lambda b, qi, ki: (b, qi, 0))
        k_spec = pl.BlockSpec((1, tkv, nx), lambda b, qi, ki: (b, ki, 1))
        v_spec = pl.BlockSpec((1, tkv, nx), lambda b, qi, ki: (b, ki, 2))
    else:
        # Fallback keeps the (8,128) BlockSpec rule via full-last-dim blocks.
        q = qkv[:, :, :nx]
        k = qkv[:, :, nx:2 * nx]
        v = qkv[:, :, 2 * nx:]
        operands = (q, k, v)
        q_spec = pl.BlockSpec((1, tq, nx), lambda b, qi, ki: (b, qi, 0))
        k_spec = pl.BlockSpec((1, tkv, nx), lambda b, qi, ki: (b, ki, 0))
        v_spec = pl.BlockSpec((1, tkv, nx), lambda b, qi, ki: (b, ki, 0))

    return pl.pallas_call(
        kern,
        out_shape=jax.ShapeDtypeStruct((B, S, nx), qkv.dtype),
        grid_spec=pltpu.PrefetchScalarGridSpec(
            num_scalar_prefetch=0,
            grid=grid,
            in_specs=[q_spec, k_spec, v_spec],
            out_specs=pl.BlockSpec((1, tq, nx), lambda b, qi, ki: (b, qi, 0)),
            scratch_shapes=[
                pltpu.VMEM((n_head, tq, 1), jnp.float32),   # running max m
                pltpu.VMEM((n_head, tq, 1), jnp.float32),   # running denom l
                pltpu.VMEM((tq, nx), jnp.float32),          # lane-dense accumulator
            ],
        ),
        compiler_params=pltpu.CompilerParams(
            # B (>=2 in practice) and q-tiles feed the v7x megacore; KV axis is the reduction.
            dimension_semantics=("parallel", "parallel", "arbitrary"),
            vmem_limit_bytes=cfg.vmem_limit_bytes,
        ),
    )(*operands)


# ----------------------------------------------------------------------------
# Full Attention.forward
# ----------------------------------------------------------------------------
def attention_forward(x, c_attn_w, c_attn_b, c_proj_w, c_proj_b, *, n_head, scale):
    B, S, nx = x.shape
    D = nx // n_head

    # c_attn projection (Conv1D)
    qkv = linear(x.reshape(B * S, nx), c_attn_w, c_attn_b).reshape(B, S, 3 * nx)

    # present = stack(key.transpose(-2,-1), value) -> both (B, H, S, D), i.e. (2, B, H, S, D).
    # Single fused reshape+transpose of the k/v half of qkv (no separate split + stack copies).
    present = qkv[:, :, nx:].reshape(B, S, 2, n_head, D).transpose(2, 0, 3, 1, 4)

    # Fused flash attention: head split/merge handled inside the kernel via lane slices.
    a = causal_flash_attention(qkv, nx=nx, n_head=n_head, scale=scale)   # (B, S, nx)

    # c_proj projection (Conv1D); resid_dropout(p=0) is identity.
    out = linear(a.reshape(B * S, nx), c_proj_w, c_proj_b).reshape(B, S, nx)
    return out, present


# ----------------------------------------------------------------------------
# Pure-JAX reference (mirrors the torch module) + demo
# ----------------------------------------------------------------------------
def _reference_forward(x, c_attn_w, c_attn_b, c_proj_w, c_proj_b, *, n_head, scale):
    B, S, nx = x.shape
    D = nx // n_head
    qkv = x @ c_attn_w + c_attn_b
    q, k, v = jnp.split(qkv, 3, axis=-1)

    def split_heads(t):
        return t.reshape(B, S, n_head, D).transpose(0, 2, 1, 3)

    q, k, v = split_heads(q), split_heads(k), split_heads(v)
    w = jnp.einsum("bhqd,bhkd->bhqk", q, k)
    if scale:
        w = w / math.sqrt(D)
    b = jnp.tril(jnp.ones((S, S), jnp.float32))
    w = w * b - 10000.0 * (1.0 - b)
    w = jax.nn.softmax(w, axis=-1)
    a = jnp.einsum("bhqk,bhkd->bhqd", w, v)
    a = a.transpose(0, 2, 1, 3).reshape(B, S, nx)
    out = a @ c_proj_w + c_proj_b
    present = jnp.stack([k, v], axis=0)
    return out, present


if __name__ == "__main__":
    key = jax.random.PRNGKey(0)
    k0, k1, k2, k3, k4 = jax.random.split(key, 5)

    # Small but TPU-friendly shapes: nx a multiple of 128 exercises the fused lane-dense
    # qkv read path; B=2 gives the megacore a >=2-step parallel axis.
    B, S, nx, n_head = 2, 16, 128, 4
    scale = True

    x = jax.random.normal(k0, (B, S, nx), dtype=jnp.float32)
    c_attn_w = 0.02 * jax.random.normal(k1, (nx, 3 * nx), dtype=jnp.float32)
    c_attn_b = 0.02 * jax.random.normal(k2, (3 * nx,), dtype=jnp.float32)
    c_proj_w = 0.02 * jax.random.normal(k3, (nx, nx), dtype=jnp.float32)
    c_proj_b = 0.02 * jax.random.normal(k4, (nx,), dtype=jnp.float32)

    out, present = attention_forward(
        x, c_attn_w, c_attn_b, c_proj_w, c_proj_b, n_head=n_head, scale=scale
    )
    out = jax.block_until_ready(out)
    present = jax.block_until_ready(present)

    ref_out, ref_present = _reference_forward(
        x, c_attn_w, c_attn_b, c_proj_w, c_proj_b, n_head=n_head, scale=scale
    )

    assert out.shape == (B, S, nx)
    assert present.shape == (2, B, n_head, S, nx // n_head)
    assert jnp.allclose(out, ref_out, rtol=2e-2, atol=2e-2)
    assert jnp.allclose(present, ref_present, rtol=2e-2, atol=2e-2)

    print("KERNEL_OK")
</pallas_src>

<mosaic_0001>
module attributes {stable_mosaic.version = 11 : i64} {
  func.func @_linear_kernel(%arg0: i32, %arg1: i32, %arg2: i32, %arg3: memref<32x128xf32, #tpu.memory_space<vmem>>, %arg4: memref<128x384xf32, #tpu.memory_space<vmem>>, %arg5: memref<1x384xf32, #tpu.memory_space<vmem>>, %arg6: memref<32x384xf32, #tpu.memory_space<vmem>>, %arg7: memref<32x384xf32, #tpu.memory_space<vmem>>) attributes {dimension_semantics = [#tpu.dimension_semantics<parallel>, #tpu.dimension_semantics<parallel>, #tpu.dimension_semantics<arbitrary>], iteration_bounds = array<i64: 1, 1, 1>, scalar_prefetch = 0 : i64, scratch_operands = 1 : i64, tpu.core_type = #tpu.core_type<tc>, window_params = [{transform_indices = @transform_0, window_bounds = array<i64: 32, 128>}, {transform_indices = @transform_1, window_bounds = array<i64: 128, 384>}, {transform_indices = @transform_2, window_bounds = array<i64: 1, 384>}, {transform_indices = @transform_3, window_bounds = array<i64: 32, 384>}]} {
    %c0_i32 = arith.constant 0 : i32
    %0 = arith.cmpi eq, %arg2, %c0_i32 : i32
    %1 = arith.extui %0 : i1 to i32
    %c0_i32_0 = arith.constant 0 : i32
    %2 = arith.cmpi ne, %1, %c0_i32_0 : i32
    scf.if %2 {
      %cst_10 = arith.constant 0.000000e+00 : f32
      %12 = vector.broadcast %cst_10 : f32 to vector<32x384xf32>
      %c0_11 = arith.constant 0 : index
      %c0_12 = arith.constant 0 : index
      %13 = vector.load %arg7[%c0_11, %c0_12] : memref<32x384xf32, #tpu.memory_space<vmem>>, vector<32x384xf32>
      tpu.vector_store %arg7[%c0_11, %c0_12], %12 {strides = array<i32>} : memref<32x384xf32, #tpu.memory_space<vmem>>, vector<32x384xf32>,
    } else {
    }
    %c0 = arith.constant 0 : index
    %c0_1 = arith.constant 0 : index
    %3 = vector.load %arg7[%c0, %c0_1] : memref<32x384xf32, #tpu.memory_space<vmem>>, vector<32x384xf32>
    %c0_2 = arith.constant 0 : index
    %c0_3 = arith.constant 0 : index
    %4 = vector.load %arg3[%c0_2, %c0_3] : memref<32x128xf32, #tpu.memory_space<vmem>>, vector<32x128xf32>
    %c0_4 = arith.constant 0 : index
    %c0_5 = arith.constant 0 : index
    %5 = vector.load %arg4[%c0_4, %c0_5] : memref<128x384xf32, #tpu.memory_space<vmem>>, vector<128x384xf32>
    %cst = arith.constant dense<0.000000e+00> : vector<32x384xf32>
    %6 = tpu.matmul %4, %5, %cst {dimension_numbers = #tpu.dot_dimension_numbers<[1], [0], [0], [1], [0, 0, 1, 1], [], []>} : vector<32x128xf32>, vector<128x384xf32>, vector<32x384xf32> -> vector<32x384xf32>
    %7 = arith.addf %3, %6 : vector<32x384xf32>
    %c0_6 = arith.constant 0 : index
    %c0_7 = arith.constant 0 : index
    %8 = vector.load %arg7[%c0_6, %c0_7] : memref<32x384xf32, #tpu.memory_space<vmem>>, vector<32x384xf32>
    tpu.vector_store %arg7[%c0_6, %c0_7], %7 {strides = array<i32>} : memref<32x384xf32, #tpu.memory_space<vmem>>, vector<32x384xf32>,
    %c0_i32_8 = arith.constant 0 : i32
    %9 = arith.cmpi eq, %arg2, %c0_i32_8 : i32
    %10 = arith.extui %9 : i1 to i32
    %c0_i32_9 = arith.constant 0 : i32
    %11 = arith.cmpi ne, %10, %c0_i32_9 : i32
    scf.if %11 {
      %c0_10 = arith.constant 0 : index
      %c0_11 = arith.constant 0 : index
      %12 = vector.load %arg7[%c0_10, %c0_11] : memref<32x384xf32, #tpu.memory_space<vmem>>, vector<32x384xf32>
      %c0_12 = arith.constant 0 : index
      %c0_13 = arith.constant 0 : index
      %13 = vector.load %arg5[%c0_12, %c0_13] : memref<1x384xf32, #tpu.memory_space<vmem>>, vector<1x384xf32>
      %14 = vector.broadcast %13 : vector<1x384xf32> to vector<32x384xf32>
      %15 = arith.addf %12, %14 : vector<32x384xf32>
      %c0_14 = arith.constant 0 : index
      %c0_15 = arith.constant 0 : index
      %16 = vector.load %arg6[%c0_14, %c0_15] : memref<32x384xf32, #tpu.memory_space<vmem>>, vector<32x384xf32>
      tpu.vector_store %arg6[%c0_14, %c0_15], %15 {strides = array<i32>} : memref<32x384xf32, #tpu.memory_space<vmem>>, vector<32x384xf32>,
    } else {
    }
    return
  }
  func.func @transform_0(%arg0: i32, %arg1: i32, %arg2: i32) -> (i32, i32) {
    %c0_i32 = arith.constant 0 : i32
    return %arg0, %arg2 : i32, i32
  }
  func.func @transform_1(%arg0: i32, %arg1: i32, %arg2: i32) -> (i32, i32) {
    %c0_i32 = arith.constant 0 : i32
    return %arg2, %arg1 : i32, i32
  }
  func.func @transform_2(%arg0: i32, %arg1: i32, %arg2: i32) -> (i32, i32) {
    %c0_i32 = arith.constant 0 : i32
    %c0_i32_0 = arith.constant 0 : i32
    return %c0_i32, %arg1 : i32, i32
  }
  func.func @transform_3(%arg0: i32, %arg1: i32, %arg2: i32) -> (i32, i32) {
    %c0_i32 = arith.constant 0 : i32
    return %arg0, %arg1 : i32, i32
  }
}

</mosaic_0001>

<bundles_post_ra>
// kernel: tpu_custom_call.1
= control target key start
LH: loop header
LB: loop body
LE: loop exit
PB: predicated region body
PF: predicated region fallthrough
CT: control target
= control target key end

     0   :  { %8 = vsyncpa [#allocation4], 0  ;;  %s490_s0 = inlined_call_operand.hbm [shape: f32[32,128], index: 0, kind: input, shape index: {}]   ;;  %s491_s1 = inlined_call_operand.hbm [shape: f32[128,384], index: 1, kind: input, shape index: {}]   ;;  %s492_s2 = inlined_call_operand.hbm [shape: f32[1,384], index: 2, kind: input, shape index: {}]   ;;  %s493_s3 = inlined_call_operand.hbm [shape: f32[32,384], index: 3, kind: output, shape index: {}]  }
   0x1   :  { %9 = vsyncpa [#allocation7], 0  ;;  %s28_s14 = sshll.u32 %s491_s1, 4  ;;  %s29_s14 = int_to_ptr.hbm [resolvable:$true] %s28_s14 }
   0x2   :  { %10 = vsyncpa [#allocation5], 0  ;;  %s444_s15 = smov [#allocation6]   ;;  %s15_s19 = sshll.u32 %s490_s0, 4  ;;  %s16_s19 = int_to_ptr.hbm [resolvable:$true] %s15_s19 }
   0x3   :  { %s30_s16 = sshll.u32 %s444_s15, 4  ;;  %s445_s20 = smov 384   ;;  %s31_s16 = int_to_ptr.vmem [resolvable:$true] %s30_s16 }
   0x4   :  { %s446_s21 = smov 24   ;;  %s447_s22 = smov [#allocation3]  }
   0x5   :  { %36 = dma.hbm_to_vmem [thread:$0]  %s29_s14, 6144, %s31_s16, [#allocation7], %s445_s20, %s445_s20, %s446_s21  }
   0x6   :  { %s17_s23 = sshll.u32 %s447_s22, 4  ;;  %s448_s1 = smov 128   ;;  %s18_s23 = int_to_ptr.vmem [resolvable:$true] %s17_s23 }
   0x7   :  { %s449_s24 = smov 8   ;;  %s42_s27 = sshll.u32 %s492_s2, 4  ;;  %s43_s27 = int_to_ptr.hbm [resolvable:$true] %s42_s27 }
   0x8   :  { %23 = dma.hbm_to_vmem [thread:$0]  %s16_s19, 512, %s18_s23, [#allocation4], %s448_s1, %s448_s1, %s449_s24  }
   0x9   :  { %s450_s28 = smov [#allocation8]  }
   0xa   :  { %s44_s0 = sshll.u32 %s450_s28, 4  ;;  %s45_s0 = int_to_ptr.vmem [resolvable:$true] %s44_s0 }
   0xb   :  { %47 = dma.hbm_to_vmem [thread:$0]  %s43_s27, 48, %s45_s0, [#allocation7]  }
   0xc   :  { %438 = dma.done.wait [#allocation4], 512  }
   0xd   :  { %439 = vsyncadd [#allocation4], 4294966784 }
   0xe   :  { %440 = dma.done.wait [#allocation7], 6192  }
   0xf   :  { %441 = vsyncadd [#allocation7], 4294961104  ;;  %v139_v0 = vld [vmem:[#allocation6 + $0x178] sm:$0xff]  ;;  %v136_v1 = vld [vmem:[#allocation6 + $0x160] sm:$0xff]  ;;  %s451_s2 = smov [#allocation9]   ;;  %s304_s5 = sshll.u32 %s493_s3, 4  ;;  %s305_s5 = int_to_ptr.hbm [resolvable:$true] %s304_s5 }
  0x10   :  { %198 = vmatpush.msra.mxu2 %v139_v0  ;;  %v138_v2 = vld [vmem:[#allocation6 + $0x170] sm:$0xff]  ;;  %v137_v3 = vld [vmem:[#allocation6 + $0x168] sm:$0xff]  ;;  %v135_v5 = vld [vmem:[#allocation6 + $0x158] sm:$0xff]  ;;  %s302_s29 = sshll.u32 %s451_s2, 4  ;;  %s303_s29 = int_to_ptr.vmem [resolvable:$true] %s302_s29 }
  0x11   :  { %v133_v4 = vld [vmem:[#allocation6 + $0x148] sm:$0xff]  ;;  %169 = vmatpush.msra.mxu1 %v138_v2  ;;  %318 = vmatpush.msra.mxu3 %v137_v3  ;;  %v134_v6 = vld [vmem:[#allocation6 + $0x150] sm:$0xff]  ;;  %v132_v7 = vld [vmem:[#allocation6 + $0x140] sm:$0xff] }
  0x12   :  { %199 = vmatpush.msra.mxu2 %v136_v1  ;;  %v131_v8 = vld [vmem:[#allocation6 + $0x138] sm:$0xff]  ;;  %140 = vmatpush.msra.mxu0 %v137_v3  ;;  %v130_v9 = vld [vmem:[#allocation6 + $0x130] sm:$0xff]  ;;  %v129_v10 = vld [vmem:[#allocation6 + $0x128] sm:$0xff] }
  0x13   :  { %170 = vmatpush.msra.mxu1 %v135_v5  ;;  %319 = vmatpush.msra.mxu3 %v134_v6  ;;  %v128_v11 = vld [vmem:[#allocation6 + $0x120] sm:$0xff]  ;;  %v127_v12 = vld [vmem:[#allocation6 + $0x118] sm:$0xff]  ;;  %v126_v13 = vld [vmem:[#allocation6 + $0x110] sm:$0xff] }
  0x14   :  { %200 = vmatpush.msra.mxu2 %v133_v4  ;;  %141 = vmatpush.msra.mxu0 %v134_v6  ;;  %v125_v14 = vld [vmem:[#allocation6 + $0x108] sm:$0xff]  ;;  %v124_v15 = vld [vmem:[#allocation6 + $0x100] sm:$0xff]  ;;  %v123_v16 = vld [vmem:[#allocation6 + $0xf8] sm:$0xff] }
  0x15   :  { %171 = vmatpush.msra.mxu1 %v132_v7  ;;  %320 = vmatpush.msra.mxu3 %v131_v8  ;;  %v122_v17 = vld [vmem:[#allocation6 + $0xf0] sm:$0xff]  ;;  %v121_v18 = vld [vmem:[#allocation6 + $0xe8] sm:$0xff]  ;;  %v120_v19 = vld [vmem:[#allocation6 + $0xe0] sm:$0xff] }
  0x16   :  { %201 = vmatpush.msra.mxu2 %v130_v9  ;;  %142 = vmatpush.msra.mxu0 %v131_v8  ;;  %v119_v20 = vld [vmem:[#allocation6 + $0xd8] sm:$0xff]  ;;  %v118_v21 = vld [vmem:[#allocation6 + $0xd0] sm:$0xff]  ;;  %v117_v22 = vld [vmem:[#allocation6 + $0xc8] sm:$0xff] }
  0x17   :  { %172 = vmatpush.msra.mxu1 %v129_v10  ;;  %321 = vmatpush.msra.mxu3 %v128_v11  ;;  %v116_v23 = vld [vmem:[#allocation6 + $0xc0] sm:$0xff]  ;;  %v115_v24 = vld [vmem:[#allocation6 + $0xb8] sm:$0xff]  ;;  %v114_v25 = vld [vmem:[#allocation6 + $0xb0] sm:$0xff] }
  0x18   :  { %202 = vmatpush.msra.mxu2 %v127_v12  ;;  %143 = vmatpush.msra.mxu0 %v128_v11  ;;  %v113_v26 = vld [vmem:[#allocation6 + $0xa8] sm:$0xff]  ;;  %v112_v27 = vld [vmem:[#allocation6 + $0xa0] sm:$0xff]  ;;  %v111_v28 = vld [vmem:[#allocation6 + $0x98] sm:$0xff] }
  0x19   :  { %173 = vmatpush.msra.mxu1 %v126_v13  ;;  %322 = vmatpush.msra.mxu3 %v125_v14  ;;  %v110_v29 = vld [vmem:[#allocation6 + $0x90] sm:$0xff]  ;;  %v109_v30 = vld [vmem:[#allocation6 + $0x88] sm:$0xff]  ;;  %v108_v31 = vld [vmem:[#allocation6 + $0x80] sm:$0xff] }
  0x1a   :  { %203 = vmatpush.msra.mxu2 %v124_v15  ;;  %144 = vmatpush.msra.mxu0 %v125_v14  ;;  %v107_v32 = vld [vmem:[#allocation6 + $0x78] sm:$0xff]  ;;  %v106_v33 = vld [vmem:[#allocation6 + $0x70] sm:$0xff]  ;;  %v105_v34 = vld [vmem:[#allocation6 + $0x68] sm:$0xff] }
  0x1b   :  { %174 = vmatpush.msra.mxu1 %v123_v16  ;;  %323 = vmatpush.msra.mxu3 %v122_v17  ;;  %v104_v35 = vld [vmem:[#allocation6 + $0x60] sm:$0xff]  ;;  %v103_v36 = vld [vmem:[#allocation6 + $0x58] sm:$0xff]  ;;  %v102_v37 = vld [vmem:[#allocation6 + $0x50] sm:$0xff] }
  0x1c   :  { %204 = vmatpush.msra.mxu2 %v121_v18  ;;  %145 = vmatpush.msra.mxu0 %v122_v17  ;;  %v101_v38 = vld [vmem:[#allocation6 + $0x48] sm:$0xff]  ;;  %v100_v39 = vld [vmem:[#allocation6 + $0x40] sm:$0xff]  ;;  %v99_v40 = vld [vmem:[#allocation6 + $0x38] sm:$0xff] }
  0x1d   :  { %175 = vmatpush.msra.mxu1 %v120_v19  ;;  %324 = vmatpush.msra.mxu3 %v119_v20  ;;  %v98_v41 = vld [vmem:[#allocation6 + $0x30] sm:$0xff]  ;;  %v97_v42 = vld [vmem:[#allocation6 + $0x28] sm:$0xff]  ;;  %v96_v43 = vld [vmem:[#allocation6 + $0x20] sm:$0xff] }
  0x1e   :  { %205 = vmatpush.msra.mxu2 %v118_v21  ;;  %146 = vmatpush.msra.mxu0 %v119_v20  ;;  %v95_v44 = vld [vmem:[#allocation6 + $0x18] sm:$0xff]  ;;  %v94_v45 = vld [vmem:[#allocation6 + $0x10] sm:$0xff]  ;;  %v88_v46 = vld [vmem:[#allocation3] sm:$0xff] }
  0x1f   :  { %176 = vmatpush.msra.mxu1 %v117_v22  ;;  %325 = vmatpush.msra.mxu3 %v116_v23  ;;  %v93_v47 = vld [vmem:[#allocation6 + $0x8] sm:$0xff]  ;;  %v92_v48 = vld [vmem:[#allocation6] sm:$0xff]  ;;  %v90_v50 = vld [vmem:[#allocation3 + $0x10] sm:$0xff] }
  0x20   :  { %206 = vmatpush.msra.mxu2 %v115_v24  ;;  %147 = vmatpush.msra.mxu0 %v116_v23  ;;  %v89_v49 = vld [vmem:[#allocation3 + $0x8] sm:$0xff]  ;;  %v91_v51 = vld [vmem:[#allocation3 + $0x18] sm:$0xff]  ;;  %v266_v52 = vld [vmem:[#allocation8] sm:$0x7] }
  0x21   :  { %177 = vmatpush.msra.mxu1 %v114_v25  ;;  %326 = vmatpush.msra.mxu3 %v113_v26  ;;  %v269_v53 = vperm.slane %v266_v52, 1  ;;  %v268_v56 = vperm.slane %v266_v52, 0  ;;  %v270_v57 = vperm.slane %v266_v52, 2 }
  0x22   :  { %207 = vmatpush.msra.mxu2 %v112_v27  ;;  %148 = vmatpush.msra.mxu0 %v113_v26 }
  0x23   :  { %178 = vmatpush.msra.mxu1 %v111_v28  ;;  %327 = vmatpush.msra.mxu3 %v110_v29 }
  0x24   :  { %208 = vmatpush.msra.mxu2 %v109_v30  ;;  %149 = vmatpush.msra.mxu0 %v110_v29 }
  0x25   :  { %179 = vmatpush.msra.mxu1 %v108_v31  ;;  %328 = vmatpush.msra.mxu3 %v107_v32 }
  0x26   :  { %209 = vmatpush.msra.mxu2 %v106_v33  ;;  %150 = vmatpush.msra.mxu0 %v107_v32 }
  0x27   :  { %180 = vmatpush.msra.mxu1 %v105_v34  ;;  %329 = vmatpush.msra.mxu3 %v104_v35 }
  0x28   :  { %210 = vmatpush.msra.mxu2 %v103_v36  ;;  %151 = vmatpush.msra.mxu0 %v104_v35 }
  0x29   :  { %181 = vmatpush.msra.mxu1 %v102_v37  ;;  %330 = vmatpush.msra.mxu3 %v101_v38 }
  0x2a   :  { %211 = vmatpush.msra.mxu2 %v100_v39  ;;  %152 = vmatpush.msra.mxu0 %v101_v38 }
  0x2b   :  { %182 = vmatpush.msra.mxu1 %v99_v40  ;;  %331 = vmatpush.msra.mxu3 %v98_v41 }
  0x2c   :  { %212 = vmatpush.msra.mxu2 %v97_v42  ;;  %153 = vmatpush.msra.mxu0 %v98_v41 }
  0x2d   :  { %183 = vmatpush.msra.mxu1 %v96_v43  ;;  %332 = vmatpush.msra.mxu3 %v95_v44 }
  0x2e   :  { %213 = vmatpush.msra.mxu2 %v94_v45  ;;  %154 = vmatpush.msra.mxu0 %v95_v44 }
  0x2f   :  { %214 = vmatmul.f32.vlgmr.msra.gmra.mxu2 %v88_v46  ;;  %184 = vmatpush.msra.mxu1 %v93_v47 }
  0x30   :  { %185 = vmatmul.f32.vlgmr.msra.gmra.mxu1 %v88_v46  ;;  %333 = vmatpush.msra.mxu3 %v92_v48 }
  0x31   :  { %159 = vmatmul.f32.vlgmr.msra.gmra.mxu3 %v89_v49  ;;  %155 = vmatpush.msra.mxu0 %v92_v48 }
  0x32   :  { %156 = vmatmul.f32.vlgmr.msra.gmra.mxu0 %v88_v46 }
  0x37   :  { %217 = vmatmul.f32.gmra.mxu2 %v89_v49 }
  0x38   :  { %188 = vmatmul.f32.gmra.mxu1 %v89_v49 }
  0x39   :  { %162 = vmatmul.f32.gmra.mxu3 %v90_v50 }
  0x3f   :  { %220 = vmatmul.f32.gmra.mxu2 %v90_v50 }
  0x40   :  { %191 = vmatmul.f32.gmra.mxu1 %v90_v50 }
  0x41   :  { %165 = vmatmul.f32.gmra.mxu3 %v91_v51 }
  0x47   :  { %223 = vmatmul.f32.gmra.mxu2 %v91_v51 }
  0x48   :  { %194 = vmatmul.f32.gmra.mxu1 %v91_v51 }
  0xad   :  { %v186_v54 = vpop.f32.mrf.mxu1 }
  0xae   :  { %v275_v55 = vadd.f32 %v269_v53, %v186_v54 }
  0xaf   :  { %v157_v58 = vpop.f32.mrf.mxu0 }
  0xb0   :  { %287 = vst [vmem:[#allocation9 + $0x8] sm:$0xff] %v275_v55  ;;  %v274_v59 = vadd.f32 %v268_v56, %v157_v58 }
  0xb2   :  { %v215_v60 = vpop.f32.mrf.mxu2  ;;  %286 = vst [vmem:[#allocation9] sm:$0xff] %v274_v59 }
  0xb3   :  { %v276_v61 = vadd.f32 %v270_v57, %v215_v60 }
  0xb4   :  { %v160_v62 = vpop.f32.mrf.mxu3 }
  0xb5   :  { %288 = vst [vmem:[#allocation9 + $0x10] sm:$0xff] %v276_v61  ;;  %v277_v63 = vadd.f32 %v268_v56, %v160_v62  ;;  %v189_v0 = vpop.f32.mrf.mxu1 }
  0xb6   :  { %v278_v1 = vadd.f32 %v269_v53, %v189_v0 }
  0xb7   :  { %289 = vst [vmem:[#allocation9 + $0x18] sm:$0xff] %v277_v63 }
  0xb8   :  { %290 = vst [vmem:[#allocation9 + $0x20] sm:$0xff] %v278_v1 }
  0xba   :  { %v218_v2 = vpop.f32.mrf.mxu2 }
  0xbb   :  { %v279_v3 = vadd.f32 %v270_v57, %v218_v2 }
  0xbc   :  { %v163_v4 = vpop.f32.mrf.mxu3 }
  0xbd   :  { %291 = vst [vmem:[#allocation9 + $0x28] sm:$0xff] %v279_v3  ;;  %v280_v5 = vadd.f32 %v268_v56, %v163_v4  ;;  %v192_v6 = vpop.f32.mrf.mxu1 }
  0xbe   :  { %v281_v7 = vadd.f32 %v269_v53, %v192_v6 }
  0xbf   :  { %292 = vst [vmem:[#allocation9 + $0x30] sm:$0xff] %v280_v5 }
  0xc0   :  { %293 = vst [vmem:[#allocation9 + $0x38] sm:$0xff] %v281_v7 }
  0xc2   :  { %v221_v8 = vpop.f32.mrf.mxu2 }
  0xc3   :  { %v282_v9 = vadd.f32 %v270_v57, %v221_v8 }
  0xc4   :  { %v166_v10 = vpop.f32.mrf.mxu3 }
  0xc5   :  { %294 = vst [vmem:[#allocation9 + $0x40] sm:$0xff] %v282_v9  ;;  %v283_v11 = vadd.f32 %v268_v56, %v166_v10  ;;  %v195_v12 = vpop.f32.mrf.mxu1 }
  0xc6   :  { %v284_v13 = vadd.f32 %v269_v53, %v195_v12 }
  0xc7   :  { %295 = vst [vmem:[#allocation9 + $0x48] sm:$0xff] %v283_v11 }
  0xc8   :  { %296 = vst [vmem:[#allocation9 + $0x50] sm:$0xff] %v284_v13 }
  0xca   :  { %v224_v14 = vpop.f32.mrf.mxu2 }
  0xcb   :  { %v285_v15 = vadd.f32 %v270_v57, %v224_v14 }
  0xcd   :  { %297 = vst [vmem:[#allocation9 + $0x58] sm:$0xff] %v285_v15 }
  0xce   :  { %310 = dma.vmem_to_hbm [thread:$0]  %s303_s29, 1536, %s305_s5, [#allocation5], %s445_s20, %s445_s20, %s446_s21  }
  0xcf   :  { %442 = dma.done.wait [#allocation5], 1536  }
  0xd0   :  { %443 = vsyncadd [#allocation5], 4294965760 }
  0xd1   :  { %315 = vsyncpa [#allocation4], 1 }
  0xd2   :  { %316 = vsyncpa [#allocation7], 1 }
  0xd3   :  { %317 = vsyncpa [#allocation5], 1 }

</bundles_post_ra>
